<compile_context>
chip_gen: v7x
topology: tpu7x:2x2x1
jax: 0.10.0
libtpu: 0.0.40
codegen_flags: <defaults>
</compile_context>

<pallas_src>
import jax
import jax.numpy as jnp
from jax.experimental import pallas as pl
from jax.experimental.pallas import tpu as pltpu

# ----------------------- small Llama-like config -----------------------
BATCH = 2
SEQ = 8
HIDDEN = 32
NUM_HEADS = 4
NUM_KV_HEADS = 2
HEAD_DIM = HIDDEN // NUM_HEADS            # 8
KV_GROUPS = NUM_HEADS // NUM_KV_HEADS     # 2
SCALING = HEAD_DIM ** -0.5
ROPE_THETA = 10000.0

Q_SIZE = NUM_HEADS * HEAD_DIM             # 32
K_SIZE = NUM_KV_HEADS * HEAD_DIM          # 16
V_SIZE = NUM_KV_HEADS * HEAD_DIM          # 16
QKV_OUT = Q_SIZE + K_SIZE + V_SIZE        # 64


# ------------------------- fused forward kernel -------------------------
def _fused_attn_kernel(x_ref, wqkv_ref, wo_ref, cos_ref, sinf_ref,
                       o_ref, w_ref=None):
    x = x_ref[0]             # (S, H)
    wqkv = wqkv_ref[...]     # (QKV_OUT, H)   PyTorch layout [out, in]
    wo = wo_ref[...]         # (H, nH*D)      PyTorch layout [out, in]
    cos = cos_ref[...]       # (S, D)
    sinf = sinf_ref[...]     # (S, D)  sin with rotate_half sign pre-folded

    # Fused Q/K/V projection: one MXU call, contract on the weight's input dim
    # (no transpose materialized anywhere).
    qkv = jax.lax.dot_general(x, wqkv, (((1,), (1,)), ((), ())),
                              preferred_element_type=jnp.float32)  # (S, QKV_OUT)

    d2 = HEAD_DIM // 2

    def rope(t):  # t: (S, D); sign of rotate_half is folded into sinf
        rot = jnp.concatenate([t[:, d2:], t[:, :d2]], axis=-1)
        return t * cos + rot * sinf

    # Per-KV-head K (RoPE'd) and V, computed once and shared across groups.
    k_heads = []
    v_heads = []
    for kv in range(NUM_KV_HEADS):
        k_off = Q_SIZE + kv * HEAD_DIM
        v_off = Q_SIZE + K_SIZE + kv * HEAD_DIM
        k_heads.append(rope(qkv[:, k_off:k_off + HEAD_DIM]))
        v_heads.append(qkv[:, v_off:v_off + HEAD_DIM])

    # Additive causal mask (finfo.min like HF's eager path).
    row = jax.lax.broadcasted_iota(jnp.int32, (SEQ, SEQ), 0)
    col = jax.lax.broadcasted_iota(jnp.int32, (SEQ, SEQ), 1)
    neg_inf = jnp.finfo(jnp.float32).min

    outs = []
    for h in range(NUM_HEADS):                       # static unrolled loop
        q_h = rope(qkv[:, h * HEAD_DIM:(h + 1) * HEAD_DIM])
        k_h = k_heads[h // KV_GROUPS]
        v_h = v_heads[h // KV_GROUPS]

        s = jax.lax.dot_general(q_h, k_h, (((1,), (1,)), ((), ())),
                                preferred_element_type=jnp.float32) * SCALING
        s = jnp.where(col <= row, s, neg_inf)

        # softmax in fp32, EUP approximate reciprocal for the denominator
        s = s - jnp.max(s, axis=-1, keepdims=True)
        p = jnp.exp(s)
        p = p * pl.reciprocal(jnp.sum(p, axis=-1, keepdims=True), approx=True)

        if w_ref is not None:                        # optional O(S^2) writeback
            w_ref[0, h] = p

        outs.append(jnp.dot(p, v_h, preferred_element_type=jnp.float32))

    # Lane-dense (S, nH*D) slab; attn output never leaves VMEM before o_proj.
    attn = jnp.concatenate(outs, axis=-1)
    o_ref[0] = jax.lax.dot_general(attn, wo, (((1,), (1,)), ((), ())),
                                   preferred_element_type=jnp.float32)


# ------------------------------ wrapper ----------------------------------
def quantized_llama_attention_forward(hidden_states, w_qkv, wo, cos, sin_folded,
                                      *, output_attentions=True):
    B, S, H = hidden_states.shape

    o_struct = jax.ShapeDtypeStruct((B, S, H), jnp.float32)
    o_spec = pl.BlockSpec((1, S, H), lambda b: (b, 0, 0))

    if output_attentions:
        out_shape = (o_struct,
                     jax.ShapeDtypeStruct((B, NUM_HEADS, S, S), jnp.float32))
        out_specs = (o_spec,
                     pl.BlockSpec((1, NUM_HEADS, S, S), lambda b: (b, 0, 0, 0)))
    else:
        out_shape = o_struct
        out_specs = o_spec

    result = pl.pallas_call(
        _fused_attn_kernel,
        out_shape=out_shape,
        grid=(B,),
        in_specs=[
            pl.BlockSpec((1, S, H), lambda b: (b, 0, 0)),
            pl.BlockSpec(w_qkv.shape, lambda b: (0, 0)),      # resident weight
            pl.BlockSpec(wo.shape, lambda b: (0, 0)),         # resident weight
            pl.BlockSpec((S, HEAD_DIM), lambda b: (0, 0)),    # shared cos table
            pl.BlockSpec((S, HEAD_DIM), lambda b: (0, 0)),    # shared sin table
        ],
        out_specs=out_specs,
        compiler_params=pltpu.CompilerParams(
            dimension_semantics=("parallel",)),                # batch -> 2 TCs on v7x
    )(hidden_states, w_qkv, wo, cos, sin_folded)

    if output_attentions:
        attn_out, attn_weights = result
        return attn_out, attn_weights
    return result, None


# -------------------- one-time parameter / table prep ---------------------
def prepare_qkv_weight(wq, wk, wv):
    # Concatenate once at parameter-load time; stays in PyTorch [out, in] layout.
    return jnp.concatenate([wq, wk, wv], axis=0)


def rope_tables(positions, head_dim, theta=ROPE_THETA):
    inv_freq = 1.0 / (theta ** (jnp.arange(0, head_dim, 2, dtype=jnp.float32)
                                / head_dim))
    freqs = positions[:, None].astype(jnp.float32) * inv_freq[None, :]
    emb = jnp.concatenate([freqs, freqs], axis=-1)       # (S, D)
    cos = jnp.cos(emb)
    sin = jnp.sin(emb)
    d2 = head_dim // 2
    # Fold rotate_half's sign into the sin table: first half negated.
    sin_folded = jnp.concatenate([-sin[:, :d2], sin[:, d2:]], axis=-1)
    return cos, sin, sin_folded


# ------------------------ pure-JAX reference check ------------------------
def _reference(hidden_states, wq, wk, wv, wo, cos, sin):
    B, S, H = hidden_states.shape
    q = (hidden_states @ wq.T).reshape(B, S, NUM_HEADS, HEAD_DIM).transpose(0, 2, 1, 3)
    k = (hidden_states @ wk.T).reshape(B, S, NUM_KV_HEADS, HEAD_DIM).transpose(0, 2, 1, 3)
    v = (hidden_states @ wv.T).reshape(B, S, NUM_KV_HEADS, HEAD_DIM).transpose(0, 2, 1, 3)

    d2 = HEAD_DIM // 2

    def rope(x):
        rot = jnp.concatenate([-x[..., d2:], x[..., :d2]], axis=-1)
        return x * cos[None, None] + rot * sin[None, None]

    q, k = rope(q), rope(k)
    k = jnp.repeat(k, KV_GROUPS, axis=1)
    v = jnp.repeat(v, KV_GROUPS, axis=1)

    s = jnp.einsum("bhqd,bhkd->bhqk", q, k) * SCALING
    mask = jnp.tril(jnp.ones((S, S), bool))
    s = jnp.where(mask[None, None], s, jnp.finfo(jnp.float32).min)
    p = jax.nn.softmax(s, axis=-1)
    o = jnp.einsum("bhqk,bhkd->bhqd", p, v)
    o = o.transpose(0, 2, 1, 3).reshape(B, S, -1) @ wo.T
    return o, p


if __name__ == "__main__":
    key = jax.random.PRNGKey(0)
    kx, kq, kk, kv, ko = jax.random.split(key, 5)

    hidden_states = jax.random.normal(kx, (BATCH, SEQ, HIDDEN), jnp.float32)
    # PyTorch Linear weights are [out_features, in_features]
    wq = 0.05 * jax.random.normal(kq, (NUM_HEADS * HEAD_DIM, HIDDEN), jnp.float32)
    wk = 0.05 * jax.random.normal(kk, (NUM_KV_HEADS * HEAD_DIM, HIDDEN), jnp.float32)
    wv = 0.05 * jax.random.normal(kv, (NUM_KV_HEADS * HEAD_DIM, HIDDEN), jnp.float32)
    wo = 0.05 * jax.random.normal(ko, (HIDDEN, NUM_HEADS * HEAD_DIM), jnp.float32)

    w_qkv = prepare_qkv_weight(wq, wk, wv)               # (64, 32), done once
    positions = jnp.arange(SEQ)
    cos, sin, sin_folded = rope_tables(positions, HEAD_DIM)   # [S, D] tables

    # Path 1: eager semantics (attention weights materialized).
    attn_output, attn_weights = quantized_llama_attention_forward(
        hidden_states, w_qkv, wo, cos, sin_folded, output_attentions=True)
    jax.block_until_ready(attn_output)
    jax.block_until_ready(attn_weights)

    ref_out, ref_w = _reference(hidden_states, wq, wk, wv, wo, cos, sin)
    assert jnp.allclose(attn_output, ref_out, atol=2e-3, rtol=2e-3)
    assert jnp.allclose(attn_weights, ref_w, atol=2e-3, rtol=2e-3)

    # Path 2: hot path without the O(S^2) attn_weights writeback.
    out_fast, w_none = quantized_llama_attention_forward(
        hidden_states, w_qkv, wo, cos, sin_folded, output_attentions=False)
    jax.block_until_ready(out_fast)
    assert w_none is None
    assert jnp.allclose(out_fast, ref_out, atol=2e-3, rtol=2e-3)

    print("KERNEL_OK")
</pallas_src>

<mosaic_0001>
module attributes {stable_mosaic.version = 11 : i64} {
  func.func @_fused_attn_kernel(%arg0: i32, %arg1: memref<1x8x32xf32, #tpu.memory_space<vmem>>, %arg2: memref<64x32xf32, #tpu.memory_space<vmem>>, %arg3: memref<32x32xf32, #tpu.memory_space<vmem>>, %arg4: memref<8x8xf32, #tpu.memory_space<vmem>>, %arg5: memref<8x8xf32, #tpu.memory_space<vmem>>, %arg6: memref<1x8x32xf32, #tpu.memory_space<vmem>>, %arg7: memref<1x4x8x8xf32, #tpu.memory_space<vmem>>) attributes {dimension_semantics = [#tpu.dimension_semantics<parallel>], iteration_bounds = array<i64: 2>, scalar_prefetch = 0 : i64, scratch_operands = 0 : i64, tpu.core_type = #tpu.core_type<tc>, window_params = [{transform_indices = @transform_0, window_bounds = array<i64: 1, 8, 32>}, {pipeline_mode = #tpu.pipeline_mode<synchronous>, transform_indices = @transform_1, window_bounds = array<i64: 64, 32>}, {pipeline_mode = #tpu.pipeline_mode<synchronous>, transform_indices = @transform_2, window_bounds = array<i64: 32, 32>}, {pipeline_mode = #tpu.pipeline_mode<synchronous>, transform_indices = @transform_3, window_bounds = array<i64: 8, 8>}, {pipeline_mode = #tpu.pipeline_mode<synchronous>, transform_indices = @transform_4, window_bounds = array<i64: 8, 8>}, {transform_indices = @transform_5, window_bounds = array<i64: 1, 8, 32>}, {transform_indices = @transform_6, window_bounds = array<i64: 1, 4, 8, 8>}]} {
    %c0 = arith.constant 0 : index
    %c0_0 = arith.constant 0 : index
    %c0_1 = arith.constant 0 : index
    %0 = vector.load %arg1[%c0, %c0_0, %c0_1] : memref<1x8x32xf32, #tpu.memory_space<vmem>>, vector<1x8x32xf32>
    %1 = vector.shape_cast %0 : vector<1x8x32xf32> to vector<8x32xf32>
    %c0_2 = arith.constant 0 : index
    %c0_3 = arith.constant 0 : index
    %2 = vector.load %arg2[%c0_2, %c0_3] : memref<64x32xf32, #tpu.memory_space<vmem>>, vector<64x32xf32>
    %c0_4 = arith.constant 0 : index
    %c0_5 = arith.constant 0 : index
    %3 = vector.load %arg3[%c0_4, %c0_5] : memref<32x32xf32, #tpu.memory_space<vmem>>, vector<32x32xf32>
    %c0_6 = arith.constant 0 : index
    %c0_7 = arith.constant 0 : index
    %4 = vector.load %arg4[%c0_6, %c0_7] : memref<8x8xf32, #tpu.memory_space<vmem>>, vector<8x8xf32>
    %c0_8 = arith.constant 0 : index
    %c0_9 = arith.constant 0 : index
    %5 = vector.load %arg5[%c0_8, %c0_9] : memref<8x8xf32, #tpu.memory_space<vmem>>, vector<8x8xf32>
    %cst = arith.constant dense<0.000000e+00> : vector<8x64xf32>
    %6 = tpu.matmul %1, %2, %cst {dimension_numbers = #tpu.dot_dimension_numbers<[1], [1], [0], [0], [0, 0, 1, 0], [], []>} : vector<8x32xf32>, vector<64x32xf32>, vector<8x64xf32> -> vector<8x64xf32>
    %7 = vector.extract_strided_slice %6 {offsets = [0, 32], sizes = [8, 8], strides = [1, 1]} : vector<8x64xf32> to vector<8x8xf32>
    %8 = vector.extract_strided_slice %7 {offsets = [0, 4], sizes = [8, 4], strides = [1, 1]} : vector<8x8xf32> to vector<8x4xf32>
    %9 = vector.extract_strided_slice %7 {offsets = [0, 0], sizes = [8, 4], strides = [1, 1]} : vector<8x8xf32> to vector<8x4xf32>
    %10 = tpu.concatenate %8, %9 in 1 : vector<8x4xf32>, vector<8x4xf32> -> vector<8x8xf32>
    %11 = arith.mulf %7, %4 : vector<8x8xf32>
    %12 = arith.mulf %10, %5 : vector<8x8xf32>
    %13 = arith.addf %11, %12 : vector<8x8xf32>
    %14 = vector.extract_strided_slice %6 {offsets = [0, 48], sizes = [8, 8], strides = [1, 1]} : vector<8x64xf32> to vector<8x8xf32>
    %15 = vector.extract_strided_slice %6 {offsets = [0, 40], sizes = [8, 8], strides = [1, 1]} : vector<8x64xf32> to vector<8x8xf32>
    %16 = vector.extract_strided_slice %15 {offsets = [0, 4], sizes = [8, 4], strides = [1, 1]} : vector<8x8xf32> to vector<8x4xf32>
    %17 = vector.extract_strided_slice %15 {offsets = [0, 0], sizes = [8, 4], strides = [1, 1]} : vector<8x8xf32> to vector<8x4xf32>
    %18 = tpu.concatenate %16, %17 in 1 : vector<8x4xf32>, vector<8x4xf32> -> vector<8x8xf32>
    %19 = arith.mulf %15, %4 : vector<8x8xf32>
    %20 = arith.mulf %18, %5 : vector<8x8xf32>
    %21 = arith.addf %19, %20 : vector<8x8xf32>
    %22 = vector.extract_strided_slice %6 {offsets = [0, 56], sizes = [8, 8], strides = [1, 1]} : vector<8x64xf32> to vector<8x8xf32>
    %23 = tpu.iota {dimensions = array<i32: 0>} : vector<8x8xi32>
    %24 = tpu.iota {dimensions = array<i32: 1>} : vector<8x8xi32>
    %25 = vector.extract_strided_slice %6 {offsets = [0, 0], sizes = [8, 8], strides = [1, 1]} : vector<8x64xf32> to vector<8x8xf32>
    %26 = vector.extract_strided_slice %25 {offsets = [0, 4], sizes = [8, 4], strides = [1, 1]} : vector<8x8xf32> to vector<8x4xf32>
    %27 = vector.extract_strided_slice %25 {offsets = [0, 0], sizes = [8, 4], strides = [1, 1]} : vector<8x8xf32> to vector<8x4xf32>
    %28 = tpu.concatenate %26, %27 in 1 : vector<8x4xf32>, vector<8x4xf32> -> vector<8x8xf32>
    %29 = arith.mulf %25, %4 : vector<8x8xf32>
    %30 = arith.mulf %28, %5 : vector<8x8xf32>
    %31 = arith.addf %29, %30 : vector<8x8xf32>
    %cst_10 = arith.constant dense<0.000000e+00> : vector<8x8xf32>
    %32 = tpu.matmul %31, %13, %cst_10 {dimension_numbers = #tpu.dot_dimension_numbers<[1], [1], [0], [0], [0, 0, 1, 0], [], []>} : vector<8x8xf32>, vector<8x8xf32>, vector<8x8xf32> -> vector<8x8xf32>
    %cst_11 = arith.constant 0.353553385 : f32
    %33 = vector.broadcast %cst_11 : f32 to vector<8x8xf32>
    %34 = arith.mulf %32, %33 : vector<8x8xf32>
    %35 = arith.cmpi sle, %24, %23 : vector<8x8xi32>
    %cst_12 = arith.constant -3.40282347E+38 : f32
    %36 = vector.broadcast %cst_12 : f32 to vector<8x8xf32>
    %37 = arith.select %35, %34, %36 : vector<8x8xi1>, vector<8x8xf32>
    %cst_13 = arith.constant dense<0xFF800000> : vector<8xf32>
    %38 = vector.multi_reduction <maximumf>, %37, %cst_13 [1] : vector<8x8xf32> to vector<8xf32>
    %39 = vector.shape_cast %38 : vector<8xf32> to vector<8x1xf32>
    %40 = vector.broadcast %39 : vector<8x1xf32> to vector<8x8xf32>
    %41 = arith.subf %37, %40 : vector<8x8xf32>
    %42 = math.exp %41 : vector<8x8xf32>
    %cst_14 = arith.constant dense<0.000000e+00> : vector<8xf32>
    %43 = vector.multi_reduction <add>, %42, %cst_14 [1] : vector<8x8xf32> to vector<8xf32>
    %44 = vector.shape_cast %43 : vector<8xf32> to vector<8x1xf32>
    %45 = tpu.reciprocal %44 {approx = true} : vector<8x1xf32> -> vector<8x1xf32>
    %46 = vector.broadcast %45 : vector<8x1xf32> to vector<8x8xf32>
    %47 = arith.mulf %42, %46 : vector<8x8xf32>
    %c0_15 = arith.constant 0 : index
    %c0_16 = arith.constant 0 : index
    %c0_17 = arith.constant 0 : index
    %c0_18 = arith.constant 0 : index
    %48 = vector.load %arg7[%c0_15, %c0_16, %c0_17, %c0_18] : memref<1x4x8x8xf32, #tpu.memory_space<vmem>>, vector<1x1x8x8xf32>
    %49 = vector.shape_cast %48 : vector<1x1x8x8xf32> to vector<8x8xf32>
    %50 = vector.shape_cast %47 : vector<8x8xf32> to vector<1x1x8x8xf32>
    tpu.vector_store %arg7[%c0_15, %c0_16, %c0_17, %c0_18], %50 {strides = array<i32>} : memref<1x4x8x8xf32, #tpu.memory_space<vmem>>, vector<1x1x8x8xf32>,
    %cst_19 = arith.constant dense<0.000000e+00> : vector<8x8xf32>
    %51 = tpu.matmul %47, %14, %cst_19 {dimension_numbers = #tpu.dot_dimension_numbers<[1], [0], [0], [1], [0, 0, 1, 1], [], []>} : vector<8x8xf32>, vector<8x8xf32>, vector<8x8xf32> -> vector<8x8xf32>
    %52 = vector.extract_strided_slice %6 {offsets = [0, 8], sizes = [8, 8], strides = [1, 1]} : vector<8x64xf32> to vector<8x8xf32>
    %53 = vector.extract_strided_slice %52 {offsets = [0, 4], sizes = [8, 4], strides = [1, 1]} : vector<8x8xf32> to vector<8x4xf32>
    %54 = vector.extract_strided_slice %52 {offsets = [0, 0], sizes = [8, 4], strides = [1, 1]} : vector<8x8xf32> to vector<8x4xf32>
    %55 = tpu.concatenate %53, %54 in 1 : vector<8x4xf32>, vector<8x4xf32> -> vector<8x8xf32>
    %56 = arith.mulf %52, %4 : vector<8x8xf32>
    %57 = arith.mulf %55, %5 : vector<8x8xf32>
    %58 = arith.addf %56, %57 : vector<8x8xf32>
    %cst_20 = arith.constant dense<0.000000e+00> : vector<8x8xf32>
    %59 = tpu.matmul %58, %13, %cst_20 {dimension_numbers = #tpu.dot_dimension_numbers<[1], [1], [0], [0], [0, 0, 1, 0], [], []>} : vector<8x8xf32>, vector<8x8xf32>, vector<8x8xf32> -> vector<8x8xf32>
    %cst_21 = arith.constant 0.353553385 : f32
    %60 = vector.broadcast %cst_21 : f32 to vector<8x8xf32>
    %61 = arith.mulf %59, %60 : vector<8x8xf32>
    %62 = arith.cmpi sle, %24, %23 : vector<8x8xi32>
    %cst_22 = arith.constant -3.40282347E+38 : f32
    %63 = vector.broadcast %cst_22 : f32 to vector<8x8xf32>
    %64 = arith.select %62, %61, %63 : vector<8x8xi1>, vector<8x8xf32>
    %cst_23 = arith.constant dense<0xFF800000> : vector<8xf32>
    %65 = vector.multi_reduction <maximumf>, %64, %cst_23 [1] : vector<8x8xf32> to vector<8xf32>
    %66 = vector.shape_cast %65 : vector<8xf32> to vector<8x1xf32>
    %67 = vector.broadcast %66 : vector<8x1xf32> to vector<8x8xf32>
    %68 = arith.subf %64, %67 : vector<8x8xf32>
    %69 = math.exp %68 : vector<8x8xf32>
    %cst_24 = arith.constant dense<0.000000e+00> : vector<8xf32>
    %70 = vector.multi_reduction <add>, %69, %cst_24 [1] : vector<8x8xf32> to vector<8xf32>
    %71 = vector.shape_cast %70 : vector<8xf32> to vector<8x1xf32>
    %72 = tpu.reciprocal %71 {approx = true} : vector<8x1xf32> -> vector<8x1xf32>
    %73 = vector.broadcast %72 : vector<8x1xf32> to vector<8x8xf32>
    %74 = arith.mulf %69, %73 : vector<8x8xf32>
    %c0_25 = arith.constant 0 : index
    %c1 = arith.constant 1 : index
    %c0_26 = arith.constant 0 : index
    %c0_27 = arith.constant 0 : index
    %75 = vector.load %arg7[%c0_25, %c1, %c0_26, %c0_27] : memref<1x4x8x8xf32, #tpu.memory_space<vmem>>, vector<1x1x8x8xf32>
    %76 = vector.shape_cast %75 : vector<1x1x8x8xf32> to vector<8x8xf32>
    %77 = vector.shape_cast %74 : vector<8x8xf32> to vector<1x1x8x8xf32>
    tpu.vector_store %arg7[%c0_25, %c1, %c0_26, %c0_27], %77 {strides = array<i32>} : memref<1x4x8x8xf32, #tpu.memory_space<vmem>>, vector<1x1x8x8xf32>,
    %cst_28 = arith.constant dense<0.000000e+00> : vector<8x8xf32>
    %78 = tpu.matmul %74, %14, %cst_28 {dimension_numbers = #tpu.dot_dimension_numbers<[1], [0], [0], [1], [0, 0, 1, 1], [], []>} : vector<8x8xf32>, vector<8x8xf32>, vector<8x8xf32> -> vector<8x8xf32>
    %79 = vector.extract_strided_slice %6 {offsets = [0, 16], sizes = [8, 8], strides = [1, 1]} : vector<8x64xf32> to vector<8x8xf32>
    %80 = vector.extract_strided_slice %79 {offsets = [0, 4], sizes = [8, 4], strides = [1, 1]} : vector<8x8xf32> to vector<8x4xf32>
    %81 = vector.extract_strided_slice %79 {offsets = [0, 0], sizes = [8, 4], strides = [1, 1]} : vector<8x8xf32> to vector<8x4xf32>
    %82 = tpu.concatenate %80, %81 in 1 : vector<8x4xf32>, vector<8x4xf32> -> vector<8x8xf32>
    %83 = arith.mulf %79, %4 : vector<8x8xf32>
    %84 = arith.mulf %82, %5 : vector<8x8xf32>
    %85 = arith.addf %83, %84 : vector<8x8xf32>
    %cst_29 = arith.constant dense<0.000000e+00> : vector<8x8xf32>
    %86 = tpu.matmul %85, %21, %cst_29 {dimension_numbers = #tpu.dot_dimension_numbers<[1], [1], [0], [0], [0, 0, 1, 0], [], []>} : vector<8x8xf32>, vector<8x8xf32>, vector<8x8xf32> -> vector<8x8xf32>
    %cst_30 = arith.constant 0.353553385 : f32
    %87 = vector.broadcast %cst_30 : f32 to vector<8x8xf32>
    %88 = arith.mulf %86, %87 : vector<8x8xf32>
    %89 = arith.cmpi sle, %24, %23 : vector<8x8xi32>
    %cst_31 = arith.constant -3.40282347E+38 : f32
    %90 = vector.broadcast %cst_31 : f32 to vector<8x8xf32>
    %91 = arith.select %89, %88, %90 : vector<8x8xi1>, vector<8x8xf32>
    %cst_32 = arith.constant dense<0xFF800000> : vector<8xf32>
    %92 = vector.multi_reduction <maximumf>, %91, %cst_32 [1] : vector<8x8xf32> to vector<8xf32>
    %93 = vector.shape_cast %92 : vector<8xf32> to vector<8x1xf32>
    %94 = vector.broadcast %93 : vector<8x1xf32> to vector<8x8xf32>
    %95 = arith.subf %91, %94 : vector<8x8xf32>
    %96 = math.exp %95 : vector<8x8xf32>
    %cst_33 = arith.constant dense<0.000000e+00> : vector<8xf32>
    %97 = vector.multi_reduction <add>, %96, %cst_33 [1] : vector<8x8xf32> to vector<8xf32>
    %98 = vector.shape_cast %97 : vector<8xf32> to vector<8x1xf32>
    %99 = tpu.reciprocal %98 {approx = true} : vector<8x1xf32> -> vector<8x1xf32>
    %100 = vector.broadcast %99 : vector<8x1xf32> to vector<8x8xf32>
    %101 = arith.mulf %96, %100 : vector<8x8xf32>
    %c0_34 = arith.constant 0 : index
    %c2 = arith.constant 2 : index
    %c0_35 = arith.constant 0 : index
    %c0_36 = arith.constant 0 : index
    %102 = vector.load %arg7[%c0_34, %c2, %c0_35, %c0_36] : memref<1x4x8x8xf32, #tpu.memory_space<vmem>>, vector<1x1x8x8xf32>
    %103 = vector.shape_cast %102 : vector<1x1x8x8xf32> to vector<8x8xf32>
    %104 = vector.shape_cast %101 : vector<8x8xf32> to vector<1x1x8x8xf32>
    tpu.vector_store %arg7[%c0_34, %c2, %c0_35, %c0_36], %104 {strides = array<i32>} : memref<1x4x8x8xf32, #tpu.memory_space<vmem>>, vector<1x1x8x8xf32>,
    %cst_37 = arith.constant dense<0.000000e+00> : vector<8x8xf32>
    %105 = tpu.matmul %101, %22, %cst_37 {dimension_numbers = #tpu.dot_dimension_numbers<[1], [0], [0], [1], [0, 0, 1, 1], [], []>} : vector<8x8xf32>, vector<8x8xf32>, vector<8x8xf32> -> vector<8x8xf32>
    %106 = vector.extract_strided_slice %6 {offsets = [0, 24], sizes = [8, 8], strides = [1, 1]} : vector<8x64xf32> to vector<8x8xf32>
    %107 = vector.extract_strided_slice %106 {offsets = [0, 4], sizes = [8, 4], strides = [1, 1]} : vector<8x8xf32> to vector<8x4xf32>
    %108 = vector.extract_strided_slice %106 {offsets = [0, 0], sizes = [8, 4], strides = [1, 1]} : vector<8x8xf32> to vector<8x4xf32>
    %109 = tpu.concatenate %107, %108 in 1 : vector<8x4xf32>, vector<8x4xf32> -> vector<8x8xf32>
    %110 = arith.mulf %106, %4 : vector<8x8xf32>
    %111 = arith.mulf %109, %5 : vector<8x8xf32>
    %112 = arith.addf %110, %111 : vector<8x8xf32>
    %cst_38 = arith.constant dense<0.000000e+00> : vector<8x8xf32>
    %113 = tpu.matmul %112, %21, %cst_38 {dimension_numbers = #tpu.dot_dimension_numbers<[1], [1], [0], [0], [0, 0, 1, 0], [], []>} : vector<8x8xf32>, vector<8x8xf32>, vector<8x8xf32> -> vector<8x8xf32>
    %cst_39 = arith.constant 0.353553385 : f32
    %114 = vector.broadcast %cst_39 : f32 to vector<8x8xf32>
    %115 = arith.mulf %113, %114 : vector<8x8xf32>
    %116 = arith.cmpi sle, %24, %23 : vector<8x8xi32>
    %cst_40 = arith.constant -3.40282347E+38 : f32
    %117 = vector.broadcast %cst_40 : f32 to vector<8x8xf32>
    %118 = arith.select %116, %115, %117 : vector<8x8xi1>, vector<8x8xf32>
    %cst_41 = arith.constant dense<0xFF800000> : vector<8xf32>
    %119 = vector.multi_reduction <maximumf>, %118, %cst_41 [1] : vector<8x8xf32> to vector<8xf32>
    %120 = vector.shape_cast %119 : vector<8xf32> to vector<8x1xf32>
    %121 = vector.broadcast %120 : vector<8x1xf32> to vector<8x8xf32>
    %122 = arith.subf %118, %121 : vector<8x8xf32>
    %123 = math.exp %122 : vector<8x8xf32>
    %cst_42 = arith.constant dense<0.000000e+00> : vector<8xf32>
    %124 = vector.multi_reduction <add>, %123, %cst_42 [1] : vector<8x8xf32> to vector<8xf32>
    %125 = vector.shape_cast %124 : vector<8xf32> to vector<8x1xf32>
    %126 = tpu.reciprocal %125 {approx = true} : vector<8x1xf32> -> vector<8x1xf32>
    %127 = vector.broadcast %126 : vector<8x1xf32> to vector<8x8xf32>
    %128 = arith.mulf %123, %127 : vector<8x8xf32>
    %c0_43 = arith.constant 0 : index
    %c3 = arith.constant 3 : index
    %c0_44 = arith.constant 0 : index
    %c0_45 = arith.constant 0 : index
    %129 = vector.load %arg7[%c0_43, %c3, %c0_44, %c0_45] : memref<1x4x8x8xf32, #tpu.memory_space<vmem>>, vector<1x1x8x8xf32>
    %130 = vector.shape_cast %129 : vector<1x1x8x8xf32> to vector<8x8xf32>
    %131 = vector.shape_cast %128 : vector<8x8xf32> to vector<1x1x8x8xf32>
    tpu.vector_store %arg7[%c0_43, %c3, %c0_44, %c0_45], %131 {strides = array<i32>} : memref<1x4x8x8xf32, #tpu.memory_space<vmem>>, vector<1x1x8x8xf32>,
    %cst_46 = arith.constant dense<0.000000e+00> : vector<8x8xf32>
    %132 = tpu.matmul %128, %22, %cst_46 {dimension_numbers = #tpu.dot_dimension_numbers<[1], [0], [0], [1], [0, 0, 1, 1], [], []>} : vector<8x8xf32>, vector<8x8xf32>, vector<8x8xf32> -> vector<8x8xf32>
    %133 = tpu.concatenate %51, %78, %105, %132 in 1 : vector<8x8xf32>, vector<8x8xf32>, vector<8x8xf32>, vector<8x8xf32> -> vector<8x32xf32>
    %cst_47 = arith.constant dense<0.000000e+00> : vector<8x32xf32>
    %134 = tpu.matmul %133, %3, %cst_47 {dimension_numbers = #tpu.dot_dimension_numbers<[1], [1], [0], [0], [0, 0, 1, 0], [], []>} : vector<8x32xf32>, vector<32x32xf32>, vector<8x32xf32> -> vector<8x32xf32>
    %c0_48 = arith.constant 0 : index
    %c0_49 = arith.constant 0 : index
    %c0_50 = arith.constant 0 : index
    %135 = vector.load %arg6[%c0_48, %c0_49, %c0_50] : memref<1x8x32xf32, #tpu.memory_space<vmem>>, vector<1x8x32xf32>
    %136 = vector.shape_cast %135 : vector<1x8x32xf32> to vector<8x32xf32>
    %137 = vector.shape_cast %134 : vector<8x32xf32> to vector<1x8x32xf32>
    tpu.vector_store %arg6[%c0_48, %c0_49, %c0_50], %137 {strides = array<i32>} : memref<1x8x32xf32, #tpu.memory_space<vmem>>, vector<1x8x32xf32>,
    return
  }
  func.func @transform_0(%arg0: i32) -> (i32, i32, i32) {
    %c0_i32 = arith.constant 0 : i32
    %c0_i32_0 = arith.constant 0 : i32
    %c0_i32_1 = arith.constant 0 : i32
    return %arg0, %c0_i32, %c0_i32_0 : i32, i32, i32
  }
  func.func @transform_1(%arg0: i32) -> (i32, i32) {
    %c0_i32 = arith.constant 0 : i32
    %c0_i32_0 = arith.constant 0 : i32
    %c0_i32_1 = arith.constant 0 : i32
    return %c0_i32, %c0_i32_0 : i32, i32
  }
  func.func @transform_2(%arg0: i32) -> (i32, i32) {
    %c0_i32 = arith.constant 0 : i32
    %c0_i32_0 = arith.constant 0 : i32
    %c0_i32_1 = arith.constant 0 : i32
    return %c0_i32, %c0_i32_0 : i32, i32
  }
  func.func @transform_3(%arg0: i32) -> (i32, i32) {
    %c0_i32 = arith.constant 0 : i32
    %c0_i32_0 = arith.constant 0 : i32
    %c0_i32_1 = arith.constant 0 : i32
    return %c0_i32, %c0_i32_0 : i32, i32
  }
  func.func @transform_4(%arg0: i32) -> (i32, i32) {
    %c0_i32 = arith.constant 0 : i32
    %c0_i32_0 = arith.constant 0 : i32
    %c0_i32_1 = arith.constant 0 : i32
    return %c0_i32, %c0_i32_0 : i32, i32
  }
  func.func @transform_5(%arg0: i32) -> (i32, i32, i32) {
    %c0_i32 = arith.constant 0 : i32
    %c0_i32_0 = arith.constant 0 : i32
    %c0_i32_1 = arith.constant 0 : i32
    return %arg0, %c0_i32, %c0_i32_0 : i32, i32, i32
  }
  func.func @transform_6(%arg0: i32) -> (i32, i32, i32, i32) {
    %c0_i32 = arith.constant 0 : i32
    %c0_i32_0 = arith.constant 0 : i32
    %c0_i32_1 = arith.constant 0 : i32
    %c0_i32_2 = arith.constant 0 : i32
    return %arg0, %c0_i32, %c0_i32_0, %c0_i32_1 : i32, i32, i32, i32
  }
}

</mosaic_0001>

<bundles_post_ra>
// kernel: tpu_custom_call.1
= control target key start
LH: loop header
LB: loop body
LE: loop exit
PB: predicated region body
PF: predicated region fallthrough
CT: control target
= control target key end

     0   :  { %12 = vsyncpa [#allocation3], 0  ;;  %s2107_s0 = inlined_call_operand.vmem [shape: f32[2,8,32], index: 0, kind: input, shape index: {}]   ;;  %s2108_s1 = inlined_call_operand.vmem [shape: f32[64,32], index: 1, kind: input, shape index: {}]   ;;  %s2109_s2 = inlined_call_operand.vmem [shape: f32[32,32], index: 2, kind: input, shape index: {}]   ;;  %s2110_s3 = inlined_call_operand.vmem [shape: f32[8,8], index: 3, kind: input, shape index: {}]   ;;  %s2111_s4 = inlined_call_operand.vmem [shape: f32[8,8], index: 4, kind: input, shape index: {}]   ;;  %s2112_s5 = inlined_call_operand.hbm [shape: f32[2,8,32], index: 5, kind: output, shape index: {0}]   ;;  %s2113_s6 = inlined_call_operand.hbm [shape: f32[2,4,8,8], index: 6, kind: output, shape index: {1}]  }
   0x1   :  { %14 = vsyncpa [#allocation3 + $0x1], 0 }
   0x2   :  { %15 = vsyncpa [#allocation5], 0 }
   0x3   :  { %17 = vsyncpa [#allocation5 + $0x1], 0  ;;  %s1761_s21 = smov 0   ;;  %s1763_s22 = smov 0  }
   0x4   :  { %s1765_s23 = smov 0   ;;  %s1767_s24 = smov 0  }
   0x5 LB: > { %s1782_s25 = sadd.s32 4294967295, %s1699_s24   ;;  %s1354_s26 = sadd.s32 4294967294, %s1699_s24   ;;  %s1699_s24 = sphi %s1767_s24, %s2121_s24   ;;  %s1695_s23 = sphi %s1765_s23, %s2120_s23   ;;  %s1691_s22 = sphi %s1763_s22, %s2119_s22   ;;  %s1687_s21 = sphi %s1761_s21, %s2118_s21  }
   0x6   : > { %s1786_s27 = sadd.s32 1, %s1699_s24   ;;  %s140_s28 = sadd.s32 1, %s1695_s23 }
   0x7   : > { %s137_s29 = ssub.s32 %s1699_s24, %s1786_s27  ;;  %p150_p0 = scmp.ne.s32.totalorder %s1695_s23, %s1691_s22 }
   0x8   : > { %p138_p1 = scmp.eq.s32.totalorder %s137_s29, 0  ;;  %p151_p2 = scmp.eq.s32.totalorder %s1782_s25, 1 }
   0x9   : > { %p156_p3 = scmp.ne.s32.totalorder %s1691_s22, %s1687_s21  ;;  %p157_p4 = scmp.eq.s32.totalorder %s1354_s26, 1 }
   0xa   : > { %s1797_s30 = scalar_select %p138_p1, %s1695_s23, %s140_s28  }
   0xb   : > { %p1799_p5 = por %p151_p2, %p150_p0  ;;  %p1803_p6 = por %p157_p4, %p156_p3 }
   0xc   : > { %p1357_p7 = scmp.ge.s32.totalorder %s1699_s24, 1  ;;  %p220_p8 = scmp.lt.s32.totalorder %s1699_s24, 3 }
   0xe   : > { %p221_p9 = pnand %p1357_p7, %p220_p8 }
   0xf   : > { %v259_v0 = vld [vmem:[%s2108_s1] sm:$0xff] (!%p221_p9)  ;;  %v260_v1 = vld [vmem:[%s2108_s1 + $0x8] sm:$0xff] (!%p221_p9)  ;;  %vm273_vm0 = vcmask (!%p221_p9), 261120   ;;  %v1701_v2 = vmov (!%p221_p9), 0.0|0.0   ;;  %vm1702_vm2 = vmmov (!%p221_p9), 0   ;;  %v1703_v5 = vmov (!%p221_p9), 0.0  }
  0x10   : > { %224 = sbr.rel (%p221_p9) target bundleno = 3300 (0xce4), region = 40  ;;  %1498 = vmatprep.subr.bf16.mxu0 (!%p221_p9), %v1701_v2  ;;  %v1499_v3 = vpack.c.bf16 (!%p221_p9), %v260_v1, %v259_v0  ;;  %vm1818_vm1 = vmpackc.low (!%p221_p9), %vm273_vm0, %vm273_vm0  ;;  %1444 = vmatprep.mubr.msk.f32.mxu0 (!%p221_p9), %vm1702_vm2, %v1703_v5  ;;  %v1830_v6 = vld [vmem:[%s2110_s3] sm:$0xff] (!%p221_p9)  ;;  %v261_v7 = vld [vmem:[%s2108_s1 + $0x10] sm:$0xff] (!%p221_p9)  ;;  %s1704_s19 = smov (!%p221_p9), 32   ;;  %vm378_vm3 = vcmask (!%p221_p9), 31744   ;;  %vm422_vm4 = vcmask (!%p221_p9), 64512   ;;  %v405_v38 = vlaneseq (!%p221_p9) }
  0x11   : > { %1447 = vmatprep.subr.mxu1 (!%p221_p9), %v1703_v5  ;;  %1449 = vmatprep.mubr.msk.f32.mxu1 (!%p221_p9), %vm1702_vm2, %v1703_v5  ;;  %v262_v8 = vld [vmem:[%s2108_s1 + $0x18] sm:$0xff] (!%p221_p9)  ;;  %v263_v10 = vld [vmem:[%s2108_s1 + $0x20] sm:$0xff] (!%p221_p9)  ;;  %v264_v11 = vld [vmem:[%s2108_s1 + $0x28] sm:$0xff] (!%p221_p9)  ;;  %p254_p10 = scmp.lt.s32.totalorder (!%p221_p9), %s1782_s25, 1  ;;  %s1705_s18 = smov (!%p221_p9), 92   ;;  %vm1138_vm6 = vcmask (!%p221_p9), 130048  }
  0x12   : > { %1501 = vmatpush3.bf16.xpose.msk.msra.mxu0 (!%p221_p9), %vm1818_vm1, %v1499_v3  ;;  %381 = vrot.lane.b32.xlu1 (!%p221_p9), %v1830_v6, %s1704_s19  ;;  %v1503_v9 = vpack.c.bf16 (!%p221_p9), %v262_v8, %v261_v7  ;;  %v1507_v12 = vpack.c.bf16 (!%p221_p9), %v264_v11, %v263_v10  ;;  %v265_v13 = vld [vmem:[%s2108_s1 + $0x30] sm:$0xff] (!%p221_p9)  ;;  %v266_v14 = vld [vmem:[%s2108_s1 + $0x38] sm:$0xff] (!%p221_p9)  ;;  %s1706_s20 = smov (!%p221_p9), 100   ;;  %s1707_s26 = smov (!%p221_p9), 124   ;;  %v1882_v20 = vld [vmem:[%s2111_s4] sm:$0xff] (!%p221_p9)  ;;  %v1908_v39 = vshrl.u32 (!%p221_p9), %v405_v38, 7 }
  0x13   : > { %1502 = vmatprep.subr.bf16.mxu0 (!%p221_p9), %v1701_v2  ;;  %v1511_v15 = vpack.c.bf16 (!%p221_p9), %v266_v14, %v265_v13  ;;  %s1708_s9 = smov (!%p221_p9), 4   ;;  %s1709_s10 = smov (!%p221_p9), 116   ;;  %v1910_v40 = vand.u32 (!%p221_p9), 127, %v405_v38  ;;  %vm1140_vm7 = vcmask (!%p221_p9), 195584  }
  0x14   : > { %s1710_s11 = smov (!%p221_p9), 8   ;;  %s1711_s12 = smov (!%p221_p9), 96  }
  0x15   : > { %vm499_vm5 = vcmp.le.s32.totalorder (!%p221_p9), %v1910_v40, %v1908_v39  ;;  %s1715_s15 = smov (!%p221_p9), 120   ;;  %s1716_s16 = smov (!%p221_p9), 40  }
  0x16   : > { %s1718_s28 = smov (!%p221_p9), 88   ;;  %s1719_s29 = smov (!%p221_p9), 112  }
  0x17   : > { %s255_s13 = scalar_select %p254_p10, %s1782_s25, 1 }
  0x19   : > { %s1360_s14 = sshll.u32 %s255_s13, 3  ;;  %s1713_s13 = smov 84  }
  0x1a   : > { %1505 = vmatpush3.bf16.xpose.msk.msra.mxu0 %vm1818_vm1, %v1503_v9  ;;  %s257_s17 = scalar_lea.vmem %s2107_s0, %s1360_s14  ;;  %s1714_s14 = smov 108  }
  0x1b   : > { %1506 = vmatprep.subr.bf16.mxu0 %v1701_v2  ;;  %v258_v16 = vld [vmem:[%s257_s17] sm:$0xff]  ;;  %s1717_s17 = smov 16  }
  0x22   : > { %1509 = vmatpush3.bf16.xpose.msk.msra.mxu0 %vm1818_vm1, %v1507_v12 }
  0x23   : > { %1510 = vmatprep.subr.bf16.mxu0 %v1701_v2 }
  0x2a   : > { %1513 = vmatpush3.bf16.xpose.msk.msra.mxu0 %vm1818_vm1, %v1511_v15 }
  0x2b   : > { %1514 = vmatprep.subr.bf16.mxu0 %v1701_v2 }
  0x31   : > { %1445 = vmatmul.mubr.msk.f32.vlgmr.msra.gmra.mrb[0].mxu0 %vm273_vm0, %v258_v16 }
  0x32   : > { %1495 = vmatprep.mubr.msk.f32.mxu0 %vm1702_vm2, %v1703_v5 }
  0x84   : > { %v382_v24 = vpop.permute.xlu1 %381 }
 0x104   : > { %v1872_v17 = vpop.f32.mrb[0].mxu0 }
 0x105   : > { %372 = vrot.lane.b32.xlu0 %v1872_v17, %s1705_s18  ;;  %v1446_v18 = vpop.f32.mrb[1].mxu0  ;;  %v384_v25 = vmul.f32 %v382_v24, %v1872_v17  ;;  %v416_v31 = vmul.f32 %v1872_v17, %v1830_v6  ;;  %s1934_s18 = sand.u32 1, %s1691_s22  }
 0x109   : > { %375 = vrot.lane.b32.xlu0 %v1872_v17, %s1706_s20  ;;  %s1359_s20 = sshll.u32 %s1934_s18, 5 }
 0x10d   : > { %409 = vrot.lane.b32.xlu0 %v1872_v17, %s1707_s26  ;;  %s1938_s26 = scalar_lea.vmem [#allocation4], %s1359_s20 }
 0x177   : > { %v1877_v19 = vpop.permute.xlu0 %372 }
 0x17b   : > { %v1884_v21 = vpop.permute.xlu0 %375 }
 0x17c   : > { %v379_v22 = vsel %vm378_vm3, %v1877_v19, %v1884_v21 }
 0x17d   : > { %v385_v23 = vmul.f32 %v379_v22, %v1882_v20 }
 0x17f   : > { %387 = vrot.lane.b32.xlu1 %v385_v23, %s1704_s19  ;;  %v410_v28 = vpop.permute.xlu0 %409  ;;  %s1712_s19 = smov 80  }
 0x183   : > { %412 = vrot.lane.b32.xlu1 %v1872_v17, %s1708_s9  ;;  %s1720_s9 = smov 24  }
 0x187   : > { %589 = vrot.lane.b32.xlu1 %v1872_v17, %s1709_s10  ;;  %s1721_s10 = smov 72  }
 0x18b   : > { %593 = vrot.lane.b32.xlu1 %v1830_v6, %s1710_s11 }
 0x1f1   : > { %v388_v26 = vpop.permute.xlu1 %387 }
 0x1f2   : > { %v390_v27 = vadd.f32 %v388_v26, %v384_v25 }
 0x1f4   : > { %420 = vrot.lane.b32.xlu0 %v390_v27, %s1711_s12  ;;  %s1722_s12 = smov 104  }
 0x1f5   : > { %v413_v29 = vpop.permute.xlu1 %412 }
 0x1f6   : > { %v415_v30 = vsel %vm378_vm3, %v410_v28, %v413_v29 }
 0x1f7   : > { %v417_v32 = vmul.f32 %v415_v30, %v1882_v20 }
 0x1f9   : > { %v418_v33 = vadd.f32 %v417_v32, %v416_v31  ;;  %v590_v34 = vpop.permute.xlu1 %589 }
 0x1fa   : > { %v592_v35 = vsel %vm378_vm3, %v590_v34, %v410_v28 }
 0x1fb   : > { %v597_v36 = vmul.f32 %v592_v35, %v1882_v20 }
 0x1fd   : > { %599 = vrot.lane.b32.xlu1 %v597_v36, %s1710_s11  ;;  %v594_v52 = vpop.permute.xlu1 %593 }
 0x1fe   : > { %v596_v54 = vmul.f32 %v594_v52, %v1872_v17 }
 0x266   : > { %v421_v37 = vpop.permute.xlu0 %420 }
 0x267   : > { %1448 = vmatpush3.xpose.msk.msra.mxu1 %vm422_vm4, %v421_v37 }
 0x268   : > { %1452 = vmatprep.subr.mxu1 %v1703_v5 }
 0x26a   : > { %1450 = vmatmul.mubr.msk.f32.vlgmr.msra.gmra.mrb[0].mxu1 %vm422_vm4, %v418_v33 }
 0x26b   : > { %1454 = vmatprep.mubr.msk.f32.mxu1 %vm1702_vm2, %v1703_v5 }
 0x26f   : > { %v600_v53 = vpop.permute.xlu1 %599 }
 0x270   : > { %v602_v55 = vadd.f32 %v600_v53, %v596_v54 }
 0x33d   : > { %v494_v41 = vpop.f32.mrb[0].mxu1 }
 0x33e   : > { %v498_v42 = vmul.f32 0.35355338, %v494_v41  ;;  %v1451_v43 = vpop.f32.mrb[1].mxu1 }
 0x340   : > { %v500_v44 = vsel %vm499_vm5, %v498_v42, -3.4028235e+38 }
 0x341   : > { %v501_v45 = vsel %vm422_vm4, %v500_v44, -inf }
 0x342   : > { %502 = vmax.xlane.f32.xlu0 %v501_v45 }
 0x358   : > { %513 = vrot.lane.b32.xlu0 %v1872_v17, %s1712_s19 }
 0x35c   : > { %391 = vrot.lane.b32.xlu0 %v1872_v17, %s1713_s13  ;;  %s1234_s13 = scalar_lea.sflag [#allocation5], %s1934_s18 }
 0x360   : > { %766 = vrot.lane.b32.xlu0 %v1872_v17, %s1714_s14 }
 0x3cf   : > { %v503_v46 = vpop.xlane.xlu0 %502 }
 0x3d0   : > { %v504_v47 = vsub.f32 %v500_v44, %v503_v46 }
 0x3d2   : > { %v505_v48 = vmul.f32 1.442695, %v504_v47 }
 0x3d3   : > { %v514_v49 = vpop.permute.xlu0 %513 }
 0x3d4   : > { %1589 = vpow2.f32 %v505_v48  ;;  %1453 = vmatpush3.msra.mxu1 %v514_v49 }
 0x3d5   : > { %1457 = vmatprep.subr.mxu1 %v1703_v5 }
 0x3d7   : > { %v392_v56 = vpop.permute.xlu0 %391 }
 0x3d8   : > { %v394_v57 = vsel %vm378_vm3, %v392_v56, %v1877_v19 }
 0x3d9   : > { %v399_v58 = vmul.f32 %v394_v57, %v1882_v20 }
 0x3db   : > { %v767_v59 = vpop.permute.xlu0 %766 }
 0x3dc   : > { %v769_v60 = vsel %vm378_vm3, %v767_v59, %v590_v34  ;;  %v951_v29 = vsel %vm378_vm3, %v1884_v21, %v767_v59 }
 0x3dd   : > { %v774_v61 = vmul.f32 %v769_v60, %v1882_v20  ;;  %v956_v30 = vmul.f32 %v951_v29, %v1882_v20 }
 0x3de   : > { %v1590_v50 = vpop.eup %1589 }
 0x3df   : > { %v507_v51 = vsel %vm422_vm4, %v1590_v50, 0.0 }
 0x3e0   : > { %508 = vadd.xlane.f32.xlu1 %v507_v51 }
 0x3f1   : > { %604 = vrot.lane.b32.xlu1 %v602_v55, %s1715_s15  ;;  %s1723_s15 = smov [#allocation4]  }
 0x3f5   : > { %395 = vrot.lane.b32.xlu1 %v1830_v6, %s1716_s16 }
 0x3f9   : > { %401 = vrot.lane.b32.xlu1 %v399_v58, %s1716_s16  ;;  %s1609_s16 = sshll.u32 %s1723_s15, 4  ;;  %s1610_s16 = int_to_ptr.vmem [resolvable:$false] %s1609_s16 }
 0x3fd   : > { %770 = vrot.lane.b32.xlu1 %v1830_v6, %s1717_s17 }
 0x401   : > { %776 = vrot.lane.b32.xlu1 %v774_v61, %s1717_s17 }
 0x46d   : > { %v509_v62 = vpop.xlane.xlu1 %508 }
 0x46e   : > { %1591 = vrcp.f32 %v509_v62 }
 0x471   : > { %v605_v1 = vpop.permute.xlu1 %604 }
 0x475   : > { %v396_v13 = vpop.permute.xlu1 %395 }
 0x476   : > { %v398_v15 = vmul.f32 %v396_v13, %v1872_v17 }
 0x478   : > { %v1592_v63 = vpop.eup %1591 }
 0x479   : > { %v511_v0 = vmul.f32 %v1592_v63, %v1590_v50  ;;  %v402_v14 = vpop.permute.xlu1 %401 }
 0x47a   : > { %v404_v16 = vadd.f32 %v402_v14, %v398_v15 }
 0x47b   : > { %1455 = vmatmul.mubr.msk.f32.vlgmr.msra.gmra.mrb[2].mxu1 %vm422_vm4, %v511_v0  ;;  %512 = vst.msk [vmem:[%s1938_s26] sm:$0xff] %vm422_vm4, %v511_v0 }
 0x47c   : > { %1458 = vmatpush3.xpose.msk.msra.mxu1 %vm422_vm4, %v421_v37  ;;  %1459 = vmatprep.mubr.msk.f32.mxu1 %vm1702_vm2, %v1703_v5 }
 0x47d   : > { %1462 = vmatprep.subr.mxu1 %v1703_v5  ;;  %v771_v25 = vpop.permute.xlu1 %770 }
 0x47e   : > { %v773_v27 = vmul.f32 %v771_v25, %v1872_v17 }
 0x47f   : > { %1460 = vmatmul.mubr.msk.f32.vlgmr.msra.gmra.mrb[4].mxu1 %vm422_vm4, %v605_v1 }
 0x480   : > { %1463 = vmatpush3.msra.mxu1 %v514_v49  ;;  %1464 = vmatprep.mubr.msk.f32.mxu1 %vm1702_vm2, %v1703_v5 }
 0x481   : > { %1467 = vmatprep.subr.mxu1 %v1703_v5  ;;  %v777_v26 = vpop.permute.xlu1 %776 }
 0x482   : > { %v779_v28 = vadd.f32 %v777_v26, %v773_v27 }
 0x54e   : > { %v1950_v3 = vpop.f32.mrb[2].mxu1 }
 0x54f   : > { %v1456_v7 = vpop.f32.mrb[3].mxu1 }
 0x552   : > { %v674_v8 = vpop.f32.mrb[4].mxu1 }
 0x553   : > { %v678_v9 = vmul.f32 0.35355338, %v674_v8  ;;  %v1461_v10 = vpop.f32.mrb[5].mxu1  ;;  %v267_v8 = vld [vmem:[%s2109_s2] sm:$0xff] }
 0x555   : > { %v679_v11 = vsel %vm499_vm5, %v678_v9, -3.4028235e+38  ;;  %v268_v9 = vld [vmem:[%s2109_s2 + $0x8] sm:$0xff] }
 0x556   : > { %v680_v12 = vsel %vm422_vm4, %v679_v11, -inf  ;;  %v1515_v10 = vpack.c.bf16 %v268_v9, %v267_v8 }
 0x557   : > { %681 = vmax.xlane.f32.xlu0 %v680_v12  ;;  %v270_v12 = vld [vmem:[%s2109_s2 + $0x18] sm:$0xff] }
 0x558   : > { %1517 = vmatpush3.bf16.xpose.msk.msra.mxu0 %vm1818_vm1, %v1515_v10 }
 0x559   : > { %1518 = vmatprep.subr.bf16.mxu0 %v1701_v2 }
 0x56d   : > { %784 = vrot.lane.b32.xlu0 %v404_v16, %s1718_s28 }
 0x5e4   : > { %v682_v18 = vpop.xlane.xlu0 %681 }
 0x5e5   : > { %v683_v19 = vsub.f32 %v679_v11, %v682_v18  ;;  %v269_v11 = vld [vmem:[%s2109_s2 + $0x10] sm:$0xff] }
 0x5e6   : > { %v1519_v13 = vpack.c.bf16 %v270_v12, %v269_v11 }
 0x5e7   : > { %v684_v22 = vmul.f32 1.442695, %v683_v19 }
 0x5e8   : > { %v785_v34 = vpop.permute.xlu0 %784  ;;  %1521 = vmatpush3.bf16.xpose.msk.msra.mxu0 %vm1818_vm1, %v1519_v13 }
 0x5e9   : > { %1593 = vpow2.f32 %v684_v22 }
 0x5f3   : > { %v1594_v23 = vpop.eup %1593 }
 0x5f4   : > { %v686_v24 = vsel %vm422_vm4, %v1594_v23, 0.0 }
 0x5f5   : > { %687 = vadd.xlane.f32.xlu1 %v686_v24 }
 0x606   : > { %781 = vrot.lane.b32.xlu1 %v779_v28, %s1719_s29  ;;  %s1260_s29 = sshll.u32 %s1938_s26, 4  ;;  %s2025_s29 = int_to_ptr.vmem [resolvable:$true] %s1260_s29 }
 0x607   : > { %s1605_s14 = scalar_lea.vmem %s2025_s29, 512  ;;  %p1612_p0 = scmp.lt.s32.totalorder %s2025_s29, %s1610_s16 }
 0x608   : > { %p1606_p11 = scmp.ne.s32.totalorder %s2025_s29, %s1605_s14 }
 0x60a   : > { %952 = vrot.lane.b32.xlu1 %v1830_v6, %s1720_s9  ;;  %p1607_p12 = pnand %p1606_p11, %p1799_p5 }
 0x60c   : > { %p1608_p13 = pneg %p1607_p12 }
 0x60e   : > { %958 = vrot.lane.b32.xlu1 %v956_v30, %s1720_s9 }
 0x682   : > { %v688_v31 = vpop.xlane.xlu1 %687 }
 0x683   : > { %1595 = vrcp.f32 %v688_v31 }
 0x686   : > { %v782_v6 = vpop.permute.xlu1 %781 }
 0x68a   : > { %v953_v42 = vpop.permute.xlu1 %952 }
 0x68b   : > { %v955_v44 = vmul.f32 %v953_v42, %v1872_v17 }
 0x68d   : > { %v1596_v32 = vpop.eup %1595 }
 0x68e   : > { %v690_v33 = vmul.f32 %v1596_v32, %v1594_v23  ;;  %v959_v43 = vpop.permute.xlu1 %958 }
 0x68f   : > { %v961_v45 = vadd.f32 %v959_v43, %v955_v44 }
 0x690   : > { %1465 = vmatmul.mubr.msk.f32.vlgmr.msra.gmra.mrb[6].mxu1 %vm422_vm4, %v690_v33  ;;  %1375 = vst.msk [vmem:[%s1938_s26 + $0x8] sm:$0xff] %vm422_vm4, %v690_v33 }
 0x691   : > { %1468 = vmatpush3.xpose.msk.msra.mxu1 %vm422_vm4, %v785_v34  ;;  %1469 = vmatprep.mubr.msk.f32.mxu1 %vm1702_vm2, %v1703_v5 }
 0x692   : > { %1472 = vmatprep.subr.mxu1 %v1703_v5 }
 0x694   : > { %1470 = vmatmul.mubr.msk.f32.vlgmr.msra.gmra.mrb[8].mxu1 %vm422_vm4, %v782_v6 }
 0x695   : > { %1474 = vmatprep.mubr.msk.f32.mxu1 %vm1702_vm2, %v1703_v5 }
 0x763   : > { %v762_v20 = vpop.f32.mrb[6].mxu1 }
 0x764   : > { %v1466_v21 = vpop.f32.mrb[7].mxu1 }
 0x767   : > { %v856_v35 = vpop.f32.mrb[8].mxu1 }
 0x768   : > { %v860_v36 = vmul.f32 0.35355338, %v856_v35  ;;  %v1471_v37 = vpop.f32.mrb[9].mxu1 }
 0x76a   : > { %v861_v38 = vsel %vm499_vm5, %v860_v36, -3.4028235e+38 }
 0x76b   : > { %v862_v41 = vsel %vm422_vm4, %v861_v38, -inf }
 0x76c   : > { %863 = vmax.xlane.f32.xlu0 %v862_v41 }
 0x782   : > { %875 = vrot.lane.b32.xlu0 %v1872_v17, %s1721_s10 }
 0x786   : > { %963 = vrot.lane.b32.xlu0 %v961_v45, %s1722_s12 }
 0x7f9   : > { %v864_v46 = vpop.xlane.xlu0 %863 }
 0x7fa   : > { %v865_v47 = vsub.f32 %v861_v38, %v864_v46 }
 0x7fc   : > { %v866_v48 = vmul.f32 1.442695, %v865_v47 }
 0x7fd   : > { %v876_v49 = vpop.permute.xlu0 %875 }
 0x7fe   : > { %1597 = vpow2.f32 %v866_v48  ;;  %1473 = vmatpush3.msra.mxu1 %v876_v49 }
 0x7ff   : > { %1477 = vmatprep.subr.mxu1 %v1703_v5 }
 0x801   : > { %v964_v54 = vpop.permute.xlu0 %963 }
 0x808   : > { %v1598_v50 = vpop.eup %1597 }
 0x809   : > { %v868_v51 = vsel %vm422_vm4, %v1598_v50, 0.0 }
 0x80a   : > { %869 = vadd.xlane.f32.xlu1 %v868_v51 }
 0x897   : > { %v870_v52 = vpop.xlane.xlu1 %869 }
 0x898   : > { %1599 = vrcp.f32 %v870_v52 }
 0x8a2   : > { %v1600_v53 = vpop.eup %1599 }
 0x8a3   : > { %v872_v17 = vmul.f32 %v1600_v53, %v1598_v50 }
 0x8a5   : > { %1475 = vmatmul.mubr.msk.f32.vlgmr.msra.gmra.mrb[10].mxu1 %vm422_vm4, %v872_v17  ;;  %1379 = vst.msk [vmem:[%s1938_s26 + $0x10] sm:$0xff] %vm422_vm4, %v872_v17 }
 0x8a6   : > { %1478 = vmatpush3.xpose.msk.msra.mxu1 %vm422_vm4, %v785_v34  ;;  %1479 = vmatprep.mubr.msk.f32.mxu1 %vm1702_vm2, %v1703_v5 }
 0x8a7   : > { %1482 = vmatprep.subr.mxu1 %v1703_v5 }
 0x8a9   : > { %1480 = vmatmul.mubr.msk.f32.vlgmr.msra.gmra.mrb[12].mxu1 %vm422_vm4, %v964_v54 }
 0x8aa   : > { %1483 = vmatpush3.msra.mxu1 %v876_v49  ;;  %1484 = vmatprep.mubr.msk.f32.mxu1 %vm1702_vm2, %v1703_v5 }
 0x978   : > { %v947_v55 = vpop.f32.mrb[10].mxu1 }
 0x979   : > { %v1476_v56 = vpop.f32.mrb[11].mxu1 }
 0x97c   : > { %v1033_v57 = vpop.f32.mrb[12].mxu1 }
 0x97d   : > { %v1037_v58 = vmul.f32 0.35355338, %v1033_v57  ;;  %v1481_v59 = vpop.f32.mrb[13].mxu1 }
 0x97f   : > { %v1038_v60 = vsel %vm499_vm5, %v1037_v58, -3.4028235e+38 }
 0x980   : > { %v1039_v61 = vsel %vm422_vm4, %v1038_v60, -inf }
 0x981   : > { %1040 = vmax.xlane.f32.xlu0 %v1039_v61 }
 0xa0e   : > { %v1041_v62 = vpop.xlane.xlu0 %1040 }
 0xa0f   : > { %v1042_v63 = vsub.f32 %v1038_v60, %v1041_v62 }
 0xa11   : > { %v1043_v0 = vmul.f32 1.442695, %v1042_v63 }
 0xa13   : > { %1601 = vpow2.f32 %v1043_v0 }
 0xa1d   : > { %v1602_v1 = vpop.eup %1601 }
 0xa1e   : > { %v1045_v5 = vsel %vm422_vm4, %v1602_v1, 0.0 }
 0xa1f   : > { %1046 = vadd.xlane.f32.xlu1 %v1045_v5 }
 0xa30   : > { %1126 = vrot.lane.b32.xlu1 %v762_v20, %s1710_s11 }
 0xa34   : > { %1130 = vrot.lane.b32.xlu1 %v947_v55, %s1717_s17 }
 0xaac   : > { %v1047_v7 = vpop.xlane.xlu1 %1046 }
 0xaad   : > { %1603 = vrcp.f32 %v1047_v7 }
 0xab0   : > { %v1127_v2 = vpop.permute.xlu1 %1126 }
 0xab1   : > { %v1137_v18 = vsel %vm422_vm4, %v1950_v3, %v1127_v2 }
 0xab4   : > { %v1131_v16 = vpop.permute.xlu1 %1130 }
 0xab5   : > { %v1139_v19 = vsel %vm1138_vm6, %v1137_v18, %v1131_v16 }
 0xab7   : > { %v1604_v39 = vpop.eup %1603 }
 0xab8   : > { %v1049_v40 = vmul.f32 %v1604_v39, %v1602_v1 }
 0xaba   : > { %1485 = vmatmul.mubr.msk.f32.vlgmr.msra.gmra.mrb[14].mxu1 %vm422_vm4, %v1049_v40  ;;  %1383 = vst.msk [vmem:[%s1938_s26 + $0x18] sm:$0xff] %vm422_vm4, %v1049_v40  ;;  %s1611_s26 = scalar_lea.vmem %s1610_s16, 1024 }
 0xabb   : > { %p1613_p1 = scmp.lt.s32.totalorder %s1611_s26, %s1605_s14 }
 0xabd   : > { %p1614_p2 = por %p1613_p1, %p1612_p0 }
 0xabf   : > { %p1615_p3 = pnand %p1614_p2, %p1608_p13 }
 0xb8d   : > { %v1121_v14 = vpop.f32.mrb[14].mxu1 }
 0xb8e   : > { %1134 = vrot.lane.b32.xlu1 %v1121_v14, %s1720_s9  ;;  %v1486_v15 = vpop.f32.mrb[15].mxu1  ;;  %s1397_s9 = sshll.u32 %s1782_s25, 9 }
 0xb8f   : > { %s2031_s19 = scalar_lea.hbm %s2113_s6, %s1397_s9 }
 0xc00   : > { %v1135_v22 = vpop.permute.xlu1 %1134 }
 0xc01   : > { %v1141_v23 = vsel %vm1140_vm7, %v1139_v19, %v1135_v22 }
 0xc02   : > { %1496 = vmatmul.mubr.msk.f32.vlgmr.msra.gmra.mrb[2].mxu0 %vm273_vm0, %v1141_v23 }
 0xc03   : > { %1618 = shalt.err (!%p1615_p3)
}
 0xc04   : > { %s1619_s17 = scalar_lea.hbm %s2031_s19, 512  ;;  %s1623_s9 = scalar_lea.hbm %s2113_s6, 1024 }
 0xc05   : > { %p1620_p4 = scmp.ne.s32.totalorder %s2031_s19, %s1619_s17  ;;  %p1624_p9 = scmp.lt.u32.totalorder %s2031_s19, %s2113_s6 }
 0xc06   : > { %p1625_p10 = scmp.lt.u32.totalorder %s1623_s9, %s1619_s17  ;;  %p1627_p12 = scmp.lt.u32.totalorder %s1619_s17, %s2031_s19 }
 0xc07   : > { %p1621_p7 = pnand %p1620_p4, %p1799_p5 }
 0xc08   : > { %p1626_p11 = por %p1625_p10, %p1624_p9 }
 0xc09   : > { %p1622_p8 = pneg %p1621_p7 }
 0xc0a   : > { %p1628_p13 = por %p1627_p12, %p1626_p11 }
 0xc0c   : > { %p1629_p0 = pnand %p1628_p13, %p1622_p8 }
 0xc0e   : > { %1632 = shalt.err (!%p1629_p0)
}
 0xc0f   : > { %s1724_s14 = smov 128   ;;  %s1358_s15 = sshll.u32 %s1934_s18, 3 }
 0xc10   : > { %1523 = dma.vmem_to_hbm [thread:$0]  (%p1799_p5), %s2025_s29, 512, %s2031_s19, %s1234_s13, %s1724_s14, %s1724_s14, %s1710_s11  }
 0xc11   : > { %s1392_s16 = sshll.u32 %s1782_s25, 7  ;;  %s246_s26 = scalar_lea.vmem [#allocation2], %s1358_s15 }
 0xc12   : > { %s1247_s17 = sshll.u32 %s246_s26, 4  ;;  %s2063_s9 = scalar_lea.hbm %s2112_s5, %s1392_s16  ;;  %s2065_s17 = int_to_ptr.vmem [resolvable:$true] %s1247_s17 }
 0xc13   : > { %s1229_s10 = scalar_lea.sflag [#allocation3], %s1934_s18  ;;  %s1633_s11 = scalar_lea.vmem %s2065_s17, 128 }
 0xc14   : > { %p1634_p1 = scmp.ne.s32.totalorder %s2065_s17, %s1633_s11  ;;  %s1725_s25 = smov [#allocation2]  }
 0xc15   : > { %s1637_s29 = sshll.u32 %s1725_s25, 4  ;;  %s1638_s29 = int_to_ptr.vmem [resolvable:$false] %s1637_s29 }
 0xc16   : > { %p1635_p2 = pnand %p1634_p1, %p1799_p5  ;;  %s1639_s19 = scalar_lea.vmem %s1638_s29, 256 }
 0xc17   : > { %p1640_p4 = scmp.lt.s32.totalorder %s2065_s17, %s1638_s29  ;;  %p1641_p7 = scmp.lt.s32.totalorder %s1639_s19, %s1633_s11 }
 0xc18   : > { %p1636_p3 = pneg %p1635_p2 }
 0xc19   : > { %p1642_p8 = por %p1641_p7, %p1640_p4 }
 0xc1b   : > { %p1643_p9 = pnand %p1642_p8, %p1636_p3 }
 0xcd5   : > { %v1223_v4 = vpop.f32.mrb[2].mxu0 }
 0xcd6   : > { %1227 = vst.msk [vmem:[%s246_s26] sm:$0xff] %vm273_vm0, %v1223_v4  ;;  %v1497_v3 = vpop.f32.mrb[3].mxu0 }
 0xcd7   : > { %1646 = shalt.err (!%p1643_p9)
}
 0xcd8   : > { %s1647_s18 = scalar_lea.hbm %s2063_s9, 128  ;;  %s1651_s14 = scalar_lea.hbm %s2112_s5, 256 }
 0xcd9   : > { %p1648_p10 = scmp.ne.s32.totalorder %s2063_s9, %s1647_s18  ;;  %p1652_p13 = scmp.lt.u32.totalorder %s2063_s9, %s2112_s5 }
 0xcda   : > { %p1653_p0 = scmp.lt.u32.totalorder %s1651_s14, %s1647_s18  ;;  %p1655_p2 = scmp.lt.u32.totalorder %s1647_s18, %s2063_s9 }
 0xcdb   : > { %p1649_p11 = pnand %p1648_p10, %p1799_p5 }
 0xcdc   : > { %p1654_p1 = por %p1653_p0, %p1652_p13 }
 0xcdd   : > { %p1650_p12 = pneg %p1649_p11 }
 0xcde   : > { %p1656_p3 = por %p1655_p2, %p1654_p1 }
 0xce0   : > { %p1657_p4 = pnand %p1656_p3, %p1650_p12 }
 0xce2   : > { %1660 = shalt.err (!%p1657_p4)
}
 0xce3   : > { %1522 = dma.vmem_to_hbm [thread:$0]  (%p1799_p5), %s2065_s17, 128, %s2063_s9, %s1229_s10  }
 0xce4 PF: > { %p1533_p7 = scmp.ge.s32.totalorder %s1699_s24, 2  ;;  %s1275_s26 = sand.u32 1, %s1687_s21  }
 0xce5   : > { %s1276_s20 = scalar_lea.sflag [#allocation3], %s1275_s26 }
 0xce6   : > { %p1527_p8 = pnand %p1533_p7, %p1803_p6 }
 0xce8   : > { %1678 = dma.done.wait (!%p1527_p8), %s1276_s20, 128  }
 0xce9   : > { %1680 = vsyncadd (!%p1527_p8), %s1276_s20, 4294967168  ;;  %s1285_s28 = scalar_lea.sflag [#allocation5], %s1275_s26 }
 0xcea   : > { %1682 = dma.done.wait (!%p1527_p8), %s1285_s28, 512  }
 0xceb   : > { %1684 = vsyncadd (!%p1527_p8), %s1285_s28, 4294966784  ;;  %p20_p5 = scmp.ge.s32.totalorder %s1786_s27, 4   ;;  %s2118_s21 = smov %s1691_s22 }
 0xcec   : > { %s2119_s22 = smov %s1695_s23  ;;  %s2120_s23 = smov %s1797_s30 }
 0xced   : > { %s2121_s24 = smov %s1786_s27  ;;  %22 = sbr.rel (!%p20_p5) target bundleno = 5 (0x5), region = 95 }
 0xcf4   :  { %1290 = vsyncpa [#allocation3], 1 }
 0xcf5   :  { %1292 = vsyncpa [#allocation3 + $0x1], 1 }
 0xcf6   :  { %1293 = vsyncpa [#allocation5], 1 }
 0xcf7   :  { %1295 = vsyncpa [#allocation5 + $0x1], 1 }

</bundles_post_ra>
